<compile_context>
chip_gen: v5e
topology: v5e:2x2
jax: 0.10.0
libtpu: 0.0.40
codegen_flags: <defaults>
</compile_context>

<pallas_src>
import functools

import jax
import jax.numpy as jnp
from jax import lax
from jax.experimental import pallas as pl
from jax.experimental.pallas import tpu as pltpu

LN_EPS = 1e-5  # torch.nn.LayerNorm default
LANE = 128


def _round_up(n, m):
    return ((n + m - 1) // m) * m


def _layernorm_relu(h, gamma, beta, true_dim):
    """LayerNorm over the first `true_dim` lanes of a lane-padded f32 tile,
    then ReLU, returned as bf16 (next matmul consumes bf16 anyway).

    Correctness relies on pack_params guarantees:
      * h columns >= true_dim are exactly zero (zero weight cols + zero bias),
        so they do not bias the mean;
      * gamma/beta are exactly zero on padded lanes, so padded lanes come out
        of the affine transform as exactly 0 (padding gamma with ones would
        leak (0 - mu) * rsqrt(var) garbage into the next layer).
    Two-pass variance (centered, masked) is used for numerical stability.
    """
    d_pad = h.shape[-1]
    inv_d = 1.0 / float(true_dim)
    mu = jnp.sum(h, axis=-1, keepdims=True) * inv_d        # zeros in padding don't bias the sum
    diff = h - mu
    if d_pad != true_dim:
        lane = lax.broadcasted_iota(jnp.int32, (1, d_pad), 1)
        diff_sq = jnp.where(lane < true_dim, diff * diff, 0.0)
    else:
        diff_sq = diff * diff
    var = jnp.sum(diff_sq, axis=-1, keepdims=True) * inv_d
    hn = diff * lax.rsqrt(var + LN_EPS)                     # EUP rsqrt
    out = jnp.maximum(hn * gamma + beta, 0.0)
    return out.astype(jnp.bfloat16)                         # bf16 inter-layer temporary


def _mlp_kernel(
    x_ref,
    w1_ref, b1_ref, g1_ref, be1_ref,
    w2_ref, b2_ref, g2_ref, be2_ref,
    w3_ref, b3_ref, g3_ref, be3_ref,
    w4_ref, b4_ref,
    out_ref,
    *, dims,
):
    d1, d2, d3 = dims  # true (unpadded) hidden dims for the LayerNorm divisors
    x = x_ref[...]     # bf16 already (cast once at the wrapper / producer)

    # Block 1: Linear -> LayerNorm -> ReLU -> Dropout(identity)
    h = jnp.dot(x, w1_ref[...], preferred_element_type=jnp.float32) + b1_ref[...]
    h = _layernorm_relu(h, g1_ref[...], be1_ref[...], d1)

    # Block 2
    h = jnp.dot(h, w2_ref[...], preferred_element_type=jnp.float32) + b2_ref[...]
    h = _layernorm_relu(h, g2_ref[...], be2_ref[...], d2)

    # Block 3
    h = jnp.dot(h, w3_ref[...], preferred_element_type=jnp.float32) + b3_ref[...]
    h = _layernorm_relu(h, g3_ref[...], be3_ref[...], d3)

    # Final Linear: narrow output (num_classes lanes), written directly.
    out = jnp.dot(h, w4_ref[...], preferred_element_type=jnp.float32) + b4_ref[...]
    out_ref[...] = out.astype(out_ref.dtype)

    # TODO(synk): dropout is identity here (eval mode); training-mode dropout
    # would need pltpu.prng_seed (seeded per batch tile) + pltpu.prng_random_bits.


def init_params(key, input_dim, hidden_dim, num_classes):
    """Unpadded f32 parameters matching SimpleClassifier's shapes.

    Linear weights are stored [in_features, out_features] (transpose of the
    PyTorch nn.Linear layout) so the kernel computes x @ W + b.
    """
    dims = [input_dim, hidden_dim, hidden_dim // 2, hidden_dim // 4, num_classes]
    keys = jax.random.split(key, 8)
    params = []
    for i in range(3):
        din, dout = dims[i], dims[i + 1]
        w = jax.random.normal(keys[2 * i], (din, dout), jnp.float32) * (1.0 / jnp.sqrt(din))
        b = jax.random.normal(keys[2 * i + 1], (dout,), jnp.float32) * 0.01
        gamma = jnp.ones((dout,), jnp.float32)
        beta = jnp.zeros((dout,), jnp.float32)
        params += [w, b, gamma, beta]
    din, dout = dims[3], dims[4]
    w4 = jax.random.normal(keys[6], (din, dout), jnp.float32) * (1.0 / jnp.sqrt(din))
    b4 = jax.random.normal(keys[7], (dout,), jnp.float32) * 0.01
    params += [w4, b4]
    return tuple(params)


def pack_params(params):
    """Zero-pad each hidden layer's lane dim to a multiple of 128, cast W to bf16.

    Zero padding (weights, biases, gamma, beta) is what keeps the padded lanes
    exactly 0 through every layer.  The final layer is NOT lane-padded: its
    output width stays num_classes so the kernel can emit a narrow output.
    """
    (w1, b1, g1, be1, w2, b2, g2, be2, w3, b3, g3, be3, w4, b4) = params
    input_dim = w1.shape[0]
    d1, d2, d3, nc = w1.shape[1], w2.shape[1], w3.shape[1], w4.shape[1]
    p1, p2, p3 = (_round_up(d, LANE) for d in (d1, d2, d3))

    def pad_w(w, kpad, npad):
        k, n = w.shape
        return jnp.pad(w, ((0, kpad - k), (0, npad - n))).astype(jnp.bfloat16)

    def pad_v(v, npad):
        return jnp.pad(v.reshape(1, -1), ((0, 0), (0, npad - v.shape[-1]))).astype(jnp.float32)

    packed = (
        pad_w(w1, input_dim, p1), pad_v(b1, p1), pad_v(g1, p1), pad_v(be1, p1),
        pad_w(w2, p1, p2),        pad_v(b2, p2), pad_v(g2, p2), pad_v(be2, p2),
        pad_w(w3, p2, p3),        pad_v(b3, p3), pad_v(g3, p3), pad_v(be3, p3),
        pad_w(w4, p3, nc),        pad_v(b4, nc),    # final layer: narrow N
    )
    return packed, (d1, d2, d3, nc)


def simple_classifier_forward(x, packed_params, true_dims, *, block_b=2048):
    """x: [B, input_dim] float32 or bfloat16. packed_params/true_dims from pack_params()."""
    B, input_dim = x.shape
    d1, d2, d3, num_classes = true_dims

    # Cast to bf16 once at the boundary (ideally already done by the producer):
    # halves input-side HBM reads; the first matmul consumed bf16 anyway.
    if x.dtype != jnp.bfloat16:
        x = x.astype(jnp.bfloat16)

    # Batch tile: multiple of 16 (bf16 sublane packing), sized so the grid has
    # >= 2 "parallel" steps whenever B allows (keeps both v7x TensorCores busy).
    # No padding of x: the ragged last block's writeback is masked by Pallas.
    bt = max(16, min(_round_up(block_b, 16), _round_up(pl.cdiv(B, 2), 16)))
    grid = (pl.cdiv(B, bt),)

    x_spec = pl.BlockSpec((bt, input_dim), lambda i: (i, 0))
    out_spec = pl.BlockSpec((bt, num_classes), lambda i: (i, 0))

    def const_spec(p):  # full array, same block every step -> fetched once, VMEM-resident
        return pl.BlockSpec(p.shape, lambda i: (0, 0))

    param_specs = [const_spec(p) for p in packed_params]

    p1 = packed_params[0].shape[-1]
    p2 = packed_params[4].shape[-1]
    p3 = packed_params[8].shape[-1]

    flops = 2 * B * (input_dim * p1 + p1 * p2 + p2 * p3 + p3 * num_classes)
    param_bytes = sum(int(p.size) * p.dtype.itemsize for p in packed_params)
    bytes_accessed = B * input_dim * 2 + B * num_classes * 4 + param_bytes

    # Right-size the VMEM request: double-buffered x/out tiles + params (x2 for
    # potential double-buffering) + f32/bf16 temporaries, with ~50% headroom.
    tile_bytes = 2 * bt * input_dim * 2 + 2 * bt * num_classes * 4
    temp_bytes = 2 * bt * max(p1, p2, p3) * (4 + 2)
    vmem_bytes = int(1.5 * (tile_bytes + 2 * param_bytes + temp_bytes)) + (2 << 20)
    vmem_bytes = min(max(vmem_bytes, 4 << 20), 64 << 20)

    out = pl.pallas_call(
        functools.partial(_mlp_kernel, dims=(d1, d2, d3)),
        out_shape=jax.ShapeDtypeStruct((B, num_classes), jnp.float32),
        grid=grid,
        in_specs=[x_spec] + param_specs,
        out_specs=out_spec,
        compiler_params=pltpu.CompilerParams(
            dimension_semantics=("parallel",),
            vmem_limit_bytes=vmem_bytes,
        ),
        cost_estimate=pl.CostEstimate(
            flops=int(flops),
            transcendentals=int(3 * B),
            bytes_accessed=int(bytes_accessed),
        ),
    )(x, *packed_params)
    return out


def reference_forward(x, params):
    """Plain-JAX reference mirroring the kernel's mixed precision (bf16 matmul
    inputs, f32 accumulation, f32 LayerNorm/ReLU)."""
    (w1, b1, g1, be1, w2, b2, g2, be2, w3, b3, g3, be3, w4, b4) = params

    def dot16(a, w):
        return jnp.dot(a.astype(jnp.bfloat16), w.astype(jnp.bfloat16),
                       preferred_element_type=jnp.float32)

    def block(h, w, b, g, be):
        h = dot16(h, w) + b
        mu = jnp.mean(h, axis=-1, keepdims=True)
        var = jnp.mean((h - mu) ** 2, axis=-1, keepdims=True)
        h = (h - mu) * lax.rsqrt(var + LN_EPS) * g + be
        return jnp.maximum(h, 0.0)

    h = block(x, w1, b1, g1, be1)
    h = block(h, w2, b2, g2, be2)
    h = block(h, w3, b3, g3, be3)
    return dot16(h, w4) + b4


if __name__ == "__main__":
    BATCH = 24          # not a multiple of the 16-row tile -> ragged last block
    INPUT_DIM = 32
    HIDDEN_DIM = 32
    NUM_CLASSES = 4

    key = jax.random.PRNGKey(0)
    kx, kp = jax.random.split(key)
    x = jax.random.normal(kx, (BATCH, INPUT_DIM), jnp.float32)
    params = init_params(kp, INPUT_DIM, HIDDEN_DIM, NUM_CLASSES)
    packed, true_dims = pack_params(params)

    # block_b=16 keeps the demo tiny while exercising a 2-step batch grid and
    # a ragged (masked-writeback) final block.
    out = simple_classifier_forward(x, packed, true_dims, block_b=16)
    out = jax.block_until_ready(out)

    ref = reference_forward(x, params)
    assert out.shape == (BATCH, NUM_CLASSES)
    assert bool(jnp.all(jnp.isfinite(out))), "non-finite output rows leaked from ragged block"
    assert jnp.allclose(out, ref, atol=1e-2, rtol=1e-2), "mismatch vs reference"

    print("KERNEL_OK")
</pallas_src>

<mosaic_0001>
module attributes {stable_mosaic.version = 11 : i64} {
  func.func @_mlp_kernel(%arg0: i32, %arg1: memref<16x32xbf16, #tpu.memory_space<vmem>>, %arg2: memref<32x128xbf16, #tpu.memory_space<vmem>>, %arg3: memref<1x128xf32, #tpu.memory_space<vmem>>, %arg4: memref<1x128xf32, #tpu.memory_space<vmem>>, %arg5: memref<1x128xf32, #tpu.memory_space<vmem>>, %arg6: memref<128x128xbf16, #tpu.memory_space<vmem>>, %arg7: memref<1x128xf32, #tpu.memory_space<vmem>>, %arg8: memref<1x128xf32, #tpu.memory_space<vmem>>, %arg9: memref<1x128xf32, #tpu.memory_space<vmem>>, %arg10: memref<128x128xbf16, #tpu.memory_space<vmem>>, %arg11: memref<1x128xf32, #tpu.memory_space<vmem>>, %arg12: memref<1x128xf32, #tpu.memory_space<vmem>>, %arg13: memref<1x128xf32, #tpu.memory_space<vmem>>, %arg14: memref<128x4xbf16, #tpu.memory_space<vmem>>, %arg15: memref<1x4xf32, #tpu.memory_space<vmem>>, %arg16: memref<16x4xf32, #tpu.memory_space<vmem>>) attributes {dimension_semantics = [#tpu.dimension_semantics<parallel>], iteration_bounds = array<i64: 2>, scalar_prefetch = 0 : i64, scratch_operands = 0 : i64, tpu.core_type = #tpu.core_type<tc>, window_params = [{transform_indices = @transform_0, window_bounds = array<i64: 16, 32>}, {pipeline_mode = #tpu.pipeline_mode<synchronous>, transform_indices = @transform_1, window_bounds = array<i64: 32, 128>}, {pipeline_mode = #tpu.pipeline_mode<synchronous>, transform_indices = @transform_2, window_bounds = array<i64: 1, 128>}, {pipeline_mode = #tpu.pipeline_mode<synchronous>, transform_indices = @transform_3, window_bounds = array<i64: 1, 128>}, {pipeline_mode = #tpu.pipeline_mode<synchronous>, transform_indices = @transform_4, window_bounds = array<i64: 1, 128>}, {pipeline_mode = #tpu.pipeline_mode<synchronous>, transform_indices = @transform_5, window_bounds = array<i64: 128, 128>}, {pipeline_mode = #tpu.pipeline_mode<synchronous>, transform_indices = @transform_6, window_bounds = array<i64: 1, 128>}, {pipeline_mode = #tpu.pipeline_mode<synchronous>, transform_indices = @transform_7, window_bounds = array<i64: 1, 128>}, {pipeline_mode = #tpu.pipeline_mode<synchronous>, transform_indices = @transform_8, window_bounds = array<i64: 1, 128>}, {pipeline_mode = #tpu.pipeline_mode<synchronous>, transform_indices = @transform_9, window_bounds = array<i64: 128, 128>}, {pipeline_mode = #tpu.pipeline_mode<synchronous>, transform_indices = @transform_10, window_bounds = array<i64: 1, 128>}, {pipeline_mode = #tpu.pipeline_mode<synchronous>, transform_indices = @transform_11, window_bounds = array<i64: 1, 128>}, {pipeline_mode = #tpu.pipeline_mode<synchronous>, transform_indices = @transform_12, window_bounds = array<i64: 1, 128>}, {pipeline_mode = #tpu.pipeline_mode<synchronous>, transform_indices = @transform_13, window_bounds = array<i64: 128, 4>}, {pipeline_mode = #tpu.pipeline_mode<synchronous>, transform_indices = @transform_14, window_bounds = array<i64: 1, 4>}, {transform_indices = @transform_15, window_bounds = array<i64: 16, 4>}]} {
    %c0 = arith.constant 0 : index
    %c0_0 = arith.constant 0 : index
    %0 = vector.load %arg1[%c0, %c0_0] : memref<16x32xbf16, #tpu.memory_space<vmem>>, vector<16x32xbf16>
    %c0_1 = arith.constant 0 : index
    %c0_2 = arith.constant 0 : index
    %1 = vector.load %arg2[%c0_1, %c0_2] : memref<32x128xbf16, #tpu.memory_space<vmem>>, vector<32x128xbf16>
    %cst = arith.constant dense<0.000000e+00> : vector<16x128xf32>
    %2 = tpu.matmul %0, %1, %cst {dimension_numbers = #tpu.dot_dimension_numbers<[1], [0], [0], [1], [0, 0, 1, 1], [], []>} : vector<16x32xbf16>, vector<32x128xbf16>, vector<16x128xf32> -> vector<16x128xf32>
    %c0_3 = arith.constant 0 : index
    %c0_4 = arith.constant 0 : index
    %3 = vector.load %arg3[%c0_3, %c0_4] : memref<1x128xf32, #tpu.memory_space<vmem>>, vector<1x128xf32>
    %4 = vector.broadcast %3 : vector<1x128xf32> to vector<16x128xf32>
    %5 = arith.addf %2, %4 : vector<16x128xf32>
    %c0_5 = arith.constant 0 : index
    %c0_6 = arith.constant 0 : index
    %6 = vector.load %arg4[%c0_5, %c0_6] : memref<1x128xf32, #tpu.memory_space<vmem>>, vector<1x128xf32>
    %c0_7 = arith.constant 0 : index
    %c0_8 = arith.constant 0 : index
    %7 = vector.load %arg5[%c0_7, %c0_8] : memref<1x128xf32, #tpu.memory_space<vmem>>, vector<1x128xf32>
    %cst_9 = arith.constant dense<0.000000e+00> : vector<16xf32>
    %8 = vector.multi_reduction <add>, %5, %cst_9 [1] : vector<16x128xf32> to vector<16xf32>
    %9 = vector.shape_cast %8 : vector<16xf32> to vector<16x1xf32>
    %cst_10 = arith.constant 3.125000e-02 : f32
    %10 = vector.broadcast %cst_10 : f32 to vector<16x1xf32>
    %11 = arith.mulf %9, %10 : vector<16x1xf32>
    %12 = vector.broadcast %11 : vector<16x1xf32> to vector<16x128xf32>
    %13 = arith.subf %5, %12 : vector<16x128xf32>
    %14 = tpu.iota {dimensions = array<i32: 1>} : vector<1x128xi32>
    %c32_i32 = arith.constant 32 : i32
    %15 = vector.broadcast %c32_i32 : i32 to vector<1x128xi32>
    %16 = arith.cmpi slt, %14, %15 : vector<1x128xi32>
    %17 = arith.mulf %13, %13 : vector<16x128xf32>
    %cst_11 = arith.constant 0.000000e+00 : f32
    %18 = vector.shape_cast %16 : vector<1x128xi1> to vector<1x128xi1>
    %19 = vector.broadcast %18 : vector<1x128xi1> to vector<16x128xi1>
    %20 = vector.broadcast %cst_11 : f32 to vector<16x128xf32>
    %21 = arith.select %19, %17, %20 : vector<16x128xi1>, vector<16x128xf32>
    %cst_12 = arith.constant dense<0.000000e+00> : vector<16xf32>
    %22 = vector.multi_reduction <add>, %21, %cst_12 [1] : vector<16x128xf32> to vector<16xf32>
    %23 = vector.shape_cast %22 : vector<16xf32> to vector<16x1xf32>
    %cst_13 = arith.constant 3.125000e-02 : f32
    %24 = vector.broadcast %cst_13 : f32 to vector<16x1xf32>
    %25 = arith.mulf %23, %24 : vector<16x1xf32>
    %cst_14 = arith.constant 9.99999974E-6 : f32
    %26 = vector.broadcast %cst_14 : f32 to vector<16x1xf32>
    %27 = arith.addf %25, %26 : vector<16x1xf32>
    %28 = math.rsqrt %27 : vector<16x1xf32>
    %29 = vector.broadcast %28 : vector<16x1xf32> to vector<16x128xf32>
    %30 = arith.mulf %13, %29 : vector<16x128xf32>
    %31 = vector.broadcast %6 : vector<1x128xf32> to vector<16x128xf32>
    %32 = arith.mulf %30, %31 : vector<16x128xf32>
    %33 = vector.broadcast %7 : vector<1x128xf32> to vector<16x128xf32>
    %34 = arith.addf %32, %33 : vector<16x128xf32>
    %cst_15 = arith.constant 0.000000e+00 : f32
    %35 = vector.broadcast %cst_15 : f32 to vector<16x128xf32>
    %36 = arith.maximumf %34, %35 : vector<16x128xf32>
    %37 = arith.truncf %36 : vector<16x128xf32> to vector<16x128xbf16>
    %c0_16 = arith.constant 0 : index
    %c0_17 = arith.constant 0 : index
    %38 = vector.load %arg6[%c0_16, %c0_17] : memref<128x128xbf16, #tpu.memory_space<vmem>>, vector<128x128xbf16>
    %cst_18 = arith.constant dense<0.000000e+00> : vector<16x128xf32>
    %39 = tpu.matmul %37, %38, %cst_18 {dimension_numbers = #tpu.dot_dimension_numbers<[1], [0], [0], [1], [0, 0, 1, 1], [], []>} : vector<16x128xbf16>, vector<128x128xbf16>, vector<16x128xf32> -> vector<16x128xf32>
    %c0_19 = arith.constant 0 : index
    %c0_20 = arith.constant 0 : index
    %40 = vector.load %arg7[%c0_19, %c0_20] : memref<1x128xf32, #tpu.memory_space<vmem>>, vector<1x128xf32>
    %41 = vector.broadcast %40 : vector<1x128xf32> to vector<16x128xf32>
    %42 = arith.addf %39, %41 : vector<16x128xf32>
    %c0_21 = arith.constant 0 : index
    %c0_22 = arith.constant 0 : index
    %43 = vector.load %arg8[%c0_21, %c0_22] : memref<1x128xf32, #tpu.memory_space<vmem>>, vector<1x128xf32>
    %c0_23 = arith.constant 0 : index
    %c0_24 = arith.constant 0 : index
    %44 = vector.load %arg9[%c0_23, %c0_24] : memref<1x128xf32, #tpu.memory_space<vmem>>, vector<1x128xf32>
    %cst_25 = arith.constant dense<0.000000e+00> : vector<16xf32>
    %45 = vector.multi_reduction <add>, %42, %cst_25 [1] : vector<16x128xf32> to vector<16xf32>
    %46 = vector.shape_cast %45 : vector<16xf32> to vector<16x1xf32>
    %cst_26 = arith.constant 6.250000e-02 : f32
    %47 = vector.broadcast %cst_26 : f32 to vector<16x1xf32>
    %48 = arith.mulf %46, %47 : vector<16x1xf32>
    %49 = vector.broadcast %48 : vector<16x1xf32> to vector<16x128xf32>
    %50 = arith.subf %42, %49 : vector<16x128xf32>
    %51 = tpu.iota {dimensions = array<i32: 1>} : vector<1x128xi32>
    %c16_i32 = arith.constant 16 : i32
    %52 = vector.broadcast %c16_i32 : i32 to vector<1x128xi32>
    %53 = arith.cmpi slt, %51, %52 : vector<1x128xi32>
    %54 = arith.mulf %50, %50 : vector<16x128xf32>
    %cst_27 = arith.constant 0.000000e+00 : f32
    %55 = vector.shape_cast %53 : vector<1x128xi1> to vector<1x128xi1>
    %56 = vector.broadcast %55 : vector<1x128xi1> to vector<16x128xi1>
    %57 = vector.broadcast %cst_27 : f32 to vector<16x128xf32>
    %58 = arith.select %56, %54, %57 : vector<16x128xi1>, vector<16x128xf32>
    %cst_28 = arith.constant dense<0.000000e+00> : vector<16xf32>
    %59 = vector.multi_reduction <add>, %58, %cst_28 [1] : vector<16x128xf32> to vector<16xf32>
    %60 = vector.shape_cast %59 : vector<16xf32> to vector<16x1xf32>
    %cst_29 = arith.constant 6.250000e-02 : f32
    %61 = vector.broadcast %cst_29 : f32 to vector<16x1xf32>
    %62 = arith.mulf %60, %61 : vector<16x1xf32>
    %cst_30 = arith.constant 9.99999974E-6 : f32
    %63 = vector.broadcast %cst_30 : f32 to vector<16x1xf32>
    %64 = arith.addf %62, %63 : vector<16x1xf32>
    %65 = math.rsqrt %64 : vector<16x1xf32>
    %66 = vector.broadcast %65 : vector<16x1xf32> to vector<16x128xf32>
    %67 = arith.mulf %50, %66 : vector<16x128xf32>
    %68 = vector.broadcast %43 : vector<1x128xf32> to vector<16x128xf32>
    %69 = arith.mulf %67, %68 : vector<16x128xf32>
    %70 = vector.broadcast %44 : vector<1x128xf32> to vector<16x128xf32>
    %71 = arith.addf %69, %70 : vector<16x128xf32>
    %cst_31 = arith.constant 0.000000e+00 : f32
    %72 = vector.broadcast %cst_31 : f32 to vector<16x128xf32>
    %73 = arith.maximumf %71, %72 : vector<16x128xf32>
    %74 = arith.truncf %73 : vector<16x128xf32> to vector<16x128xbf16>
    %c0_32 = arith.constant 0 : index
    %c0_33 = arith.constant 0 : index
    %75 = vector.load %arg10[%c0_32, %c0_33] : memref<128x128xbf16, #tpu.memory_space<vmem>>, vector<128x128xbf16>
    %cst_34 = arith.constant dense<0.000000e+00> : vector<16x128xf32>
    %76 = tpu.matmul %74, %75, %cst_34 {dimension_numbers = #tpu.dot_dimension_numbers<[1], [0], [0], [1], [0, 0, 1, 1], [], []>} : vector<16x128xbf16>, vector<128x128xbf16>, vector<16x128xf32> -> vector<16x128xf32>
    %c0_35 = arith.constant 0 : index
    %c0_36 = arith.constant 0 : index
    %77 = vector.load %arg11[%c0_35, %c0_36] : memref<1x128xf32, #tpu.memory_space<vmem>>, vector<1x128xf32>
    %78 = vector.broadcast %77 : vector<1x128xf32> to vector<16x128xf32>
    %79 = arith.addf %76, %78 : vector<16x128xf32>
    %c0_37 = arith.constant 0 : index
    %c0_38 = arith.constant 0 : index
    %80 = vector.load %arg12[%c0_37, %c0_38] : memref<1x128xf32, #tpu.memory_space<vmem>>, vector<1x128xf32>
    %c0_39 = arith.constant 0 : index
    %c0_40 = arith.constant 0 : index
    %81 = vector.load %arg13[%c0_39, %c0_40] : memref<1x128xf32, #tpu.memory_space<vmem>>, vector<1x128xf32>
    %cst_41 = arith.constant dense<0.000000e+00> : vector<16xf32>
    %82 = vector.multi_reduction <add>, %79, %cst_41 [1] : vector<16x128xf32> to vector<16xf32>
    %83 = vector.shape_cast %82 : vector<16xf32> to vector<16x1xf32>
    %cst_42 = arith.constant 1.250000e-01 : f32
    %84 = vector.broadcast %cst_42 : f32 to vector<16x1xf32>
    %85 = arith.mulf %83, %84 : vector<16x1xf32>
    %86 = vector.broadcast %85 : vector<16x1xf32> to vector<16x128xf32>
    %87 = arith.subf %79, %86 : vector<16x128xf32>
    %88 = tpu.iota {dimensions = array<i32: 1>} : vector<1x128xi32>
    %c8_i32 = arith.constant 8 : i32
    %89 = vector.broadcast %c8_i32 : i32 to vector<1x128xi32>
    %90 = arith.cmpi slt, %88, %89 : vector<1x128xi32>
    %91 = arith.mulf %87, %87 : vector<16x128xf32>
    %cst_43 = arith.constant 0.000000e+00 : f32
    %92 = vector.shape_cast %90 : vector<1x128xi1> to vector<1x128xi1>
    %93 = vector.broadcast %92 : vector<1x128xi1> to vector<16x128xi1>
    %94 = vector.broadcast %cst_43 : f32 to vector<16x128xf32>
    %95 = arith.select %93, %91, %94 : vector<16x128xi1>, vector<16x128xf32>
    %cst_44 = arith.constant dense<0.000000e+00> : vector<16xf32>
    %96 = vector.multi_reduction <add>, %95, %cst_44 [1] : vector<16x128xf32> to vector<16xf32>
    %97 = vector.shape_cast %96 : vector<16xf32> to vector<16x1xf32>
    %cst_45 = arith.constant 1.250000e-01 : f32
    %98 = vector.broadcast %cst_45 : f32 to vector<16x1xf32>
    %99 = arith.mulf %97, %98 : vector<16x1xf32>
    %cst_46 = arith.constant 9.99999974E-6 : f32
    %100 = vector.broadcast %cst_46 : f32 to vector<16x1xf32>
    %101 = arith.addf %99, %100 : vector<16x1xf32>
    %102 = math.rsqrt %101 : vector<16x1xf32>
    %103 = vector.broadcast %102 : vector<16x1xf32> to vector<16x128xf32>
    %104 = arith.mulf %87, %103 : vector<16x128xf32>
    %105 = vector.broadcast %80 : vector<1x128xf32> to vector<16x128xf32>
    %106 = arith.mulf %104, %105 : vector<16x128xf32>
    %107 = vector.broadcast %81 : vector<1x128xf32> to vector<16x128xf32>
    %108 = arith.addf %106, %107 : vector<16x128xf32>
    %cst_47 = arith.constant 0.000000e+00 : f32
    %109 = vector.broadcast %cst_47 : f32 to vector<16x128xf32>
    %110 = arith.maximumf %108, %109 : vector<16x128xf32>
    %111 = arith.truncf %110 : vector<16x128xf32> to vector<16x128xbf16>
    %c0_48 = arith.constant 0 : index
    %c0_49 = arith.constant 0 : index
    %112 = vector.load %arg14[%c0_48, %c0_49] : memref<128x4xbf16, #tpu.memory_space<vmem>>, vector<128x4xbf16>
    %cst_50 = arith.constant dense<0.000000e+00> : vector<16x4xf32>
    %113 = tpu.matmul %111, %112, %cst_50 {dimension_numbers = #tpu.dot_dimension_numbers<[1], [0], [0], [1], [0, 0, 1, 1], [], []>} : vector<16x128xbf16>, vector<128x4xbf16>, vector<16x4xf32> -> vector<16x4xf32>
    %c0_51 = arith.constant 0 : index
    %c0_52 = arith.constant 0 : index
    %114 = vector.load %arg15[%c0_51, %c0_52] : memref<1x4xf32, #tpu.memory_space<vmem>>, vector<1x4xf32>
    %115 = vector.broadcast %114 : vector<1x4xf32> to vector<16x4xf32>
    %116 = arith.addf %113, %115 : vector<16x4xf32>
    %c0_53 = arith.constant 0 : index
    %c0_54 = arith.constant 0 : index
    %117 = vector.load %arg16[%c0_53, %c0_54] : memref<16x4xf32, #tpu.memory_space<vmem>>, vector<16x4xf32>
    tpu.vector_store %arg16[%c0_53, %c0_54], %116 {strides = array<i32>} : memref<16x4xf32, #tpu.memory_space<vmem>>, vector<16x4xf32>,
    return
  }
  func.func @transform_0(%arg0: i32) -> (i32, i32) {
    %c0_i32 = arith.constant 0 : i32
    %c0_i32_0 = arith.constant 0 : i32
    return %arg0, %c0_i32 : i32, i32
  }
  func.func @transform_1(%arg0: i32) -> (i32, i32) {
    %c0_i32 = arith.constant 0 : i32
    %c0_i32_0 = arith.constant 0 : i32
    %c0_i32_1 = arith.constant 0 : i32
    return %c0_i32, %c0_i32_0 : i32, i32
  }
  func.func @transform_2(%arg0: i32) -> (i32, i32) {
    %c0_i32 = arith.constant 0 : i32
    %c0_i32_0 = arith.constant 0 : i32
    %c0_i32_1 = arith.constant 0 : i32
    return %c0_i32, %c0_i32_0 : i32, i32
  }
  func.func @transform_3(%arg0: i32) -> (i32, i32) {
    %c0_i32 = arith.constant 0 : i32
    %c0_i32_0 = arith.constant 0 : i32
    %c0_i32_1 = arith.constant 0 : i32
    return %c0_i32, %c0_i32_0 : i32, i32
  }
  func.func @transform_4(%arg0: i32) -> (i32, i32) {
    %c0_i32 = arith.constant 0 : i32
    %c0_i32_0 = arith.constant 0 : i32
    %c0_i32_1 = arith.constant 0 : i32
    return %c0_i32, %c0_i32_0 : i32, i32
  }
  func.func @transform_5(%arg0: i32) -> (i32, i32) {
    %c0_i32 = arith.constant 0 : i32
    %c0_i32_0 = arith.constant 0 : i32
    %c0_i32_1 = arith.constant 0 : i32
    return %c0_i32, %c0_i32_0 : i32, i32
  }
  func.func @transform_6(%arg0: i32) -> (i32, i32) {
    %c0_i32 = arith.constant 0 : i32
    %c0_i32_0 = arith.constant 0 : i32
    %c0_i32_1 = arith.constant 0 : i32
    return %c0_i32, %c0_i32_0 : i32, i32
  }
  func.func @transform_7(%arg0: i32) -> (i32, i32) {
    %c0_i32 = arith.constant 0 : i32
    %c0_i32_0 = arith.constant 0 : i32
    %c0_i32_1 = arith.constant 0 : i32
    return %c0_i32, %c0_i32_0 : i32, i32
  }
  func.func @transform_8(%arg0: i32) -> (i32, i32) {
    %c0_i32 = arith.constant 0 : i32
    %c0_i32_0 = arith.constant 0 : i32
    %c0_i32_1 = arith.constant 0 : i32
    return %c0_i32, %c0_i32_0 : i32, i32
  }
  func.func @transform_9(%arg0: i32) -> (i32, i32) {
    %c0_i32 = arith.constant 0 : i32
    %c0_i32_0 = arith.constant 0 : i32
    %c0_i32_1 = arith.constant 0 : i32
    return %c0_i32, %c0_i32_0 : i32, i32
  }
  func.func @transform_10(%arg0: i32) -> (i32, i32) {
    %c0_i32 = arith.constant 0 : i32
    %c0_i32_0 = arith.constant 0 : i32
    %c0_i32_1 = arith.constant 0 : i32
    return %c0_i32, %c0_i32_0 : i32, i32
  }
  func.func @transform_11(%arg0: i32) -> (i32, i32) {
    %c0_i32 = arith.constant 0 : i32
    %c0_i32_0 = arith.constant 0 : i32
    %c0_i32_1 = arith.constant 0 : i32
    return %c0_i32, %c0_i32_0 : i32, i32
  }
  func.func @transform_12(%arg0: i32) -> (i32, i32) {
    %c0_i32 = arith.constant 0 : i32
    %c0_i32_0 = arith.constant 0 : i32
    %c0_i32_1 = arith.constant 0 : i32
    return %c0_i32, %c0_i32_0 : i32, i32
  }
  func.func @transform_13(%arg0: i32) -> (i32, i32) {
    %c0_i32 = arith.constant 0 : i32
    %c0_i32_0 = arith.constant 0 : i32
    %c0_i32_1 = arith.constant 0 : i32
    return %c0_i32, %c0_i32_0 : i32, i32
  }
  func.func @transform_14(%arg0: i32) -> (i32, i32) {
    %c0_i32 = arith.constant 0 : i32
    %c0_i32_0 = arith.constant 0 : i32
    %c0_i32_1 = arith.constant 0 : i32
    return %c0_i32, %c0_i32_0 : i32, i32
  }
  func.func @transform_15(%arg0: i32) -> (i32, i32) {
    %c0_i32 = arith.constant 0 : i32
    %c0_i32_0 = arith.constant 0 : i32
    return %arg0, %c0_i32 : i32, i32
  }
}

</mosaic_0001>

<bundles_post_ra>
// kernel: tpu_custom_call.1
= control target key start
LH: loop header
LB: loop body
LE: loop exit
PB: predicated region body
PF: predicated region fallthrough
CT: control target
= control target key end

     0   :  { %s2157_s0 = inlined_call_operand.hbm [shape: bf16[24,32], index: 0, kind: input, shape index: {}]   ;;  %s2158_s1 = inlined_call_operand.hbm [shape: bf16[32,128], index: 1, kind: input, shape index: {}]   ;;  %s2159_s2 = inlined_call_operand.vmem [shape: f32[1,128], index: 2, kind: input, shape index: {}]   ;;  %s2160_s3 = inlined_call_operand.vmem [shape: f32[1,128], index: 3, kind: input, shape index: {}]   ;;  %s2161_s4 = inlined_call_operand.vmem [shape: f32[1,128], index: 4, kind: input, shape index: {}]   ;;  %s2162_s5 = inlined_call_operand.vmem [shape: bf16[128,128], index: 5, kind: input, shape index: {}]   ;;  %s2163_s6 = inlined_call_operand.vmem [shape: f32[1,128], index: 6, kind: input, shape index: {}]   ;;  %s2164_s7 = inlined_call_operand.vmem [shape: f32[1,128], index: 7, kind: input, shape index: {}]   ;;  %s2165_s8 = inlined_call_operand.vmem [shape: f32[1,128], index: 8, kind: input, shape index: {}]   ;;  %s2166_s9 = inlined_call_operand.hbm [shape: bf16[128,128], index: 9, kind: input, shape index: {}]   ;;  %s2167_s10 = inlined_call_operand.vmem [shape: f32[1,128], index: 10, kind: input, shape index: {}]   ;;  %s2168_s11 = inlined_call_operand.vmem [shape: f32[1,128], index: 11, kind: input, shape index: {}]   ;;  %s2169_s12 = inlined_call_operand.vmem [shape: f32[1,128], index: 12, kind: input, shape index: {}]   ;;  %s2170_s13 = inlined_call_operand.vmem [shape: bf16[128,4], index: 13, kind: input, shape index: {}]   ;;  %s2171_s14 = inlined_call_operand.vmem [shape: f32[1,4], index: 14, kind: input, shape index: {}]   ;;  %s2172_s15 = inlined_call_operand.vmem [shape: f32[24,4], index: 15, kind: output, shape index: {}]  }
   0x1   :  { %2178 = sst [smem:[#allocation13_spill]] %s2158_s1 }
   0x2   :  { %2179 = sst [smem:[#allocation14_spill]] %s2166_s9 }
   0x3   :  { %2180 = sst [smem:[#allocation15_spill]] %s2169_s12 }
   0x4   :  { %2181 = sst [smem:[#allocation16_spill]] %s2171_s14 }
   0x5   :  { %2182 = sst [smem:[#allocation17_spill]] %s2172_s15 }
   0x6   :  { %20 = vsyncpa [#allocation3], 0 }
   0x7   :  { %22 = vsyncpa [#allocation3 + $0x1], 0 }
   0x8   :  { %23 = vsyncpa [#allocation5], 0  ;;  %s1896_s18 = smov 0   ;;  %s1898_s19 = smov 0  }
   0x9   :  { %s1900_s20 = smov 0   ;;  %s1902_s21 = smov 0  }
   0xa LB: > { %s1915_s22 = sadd.s32 4294967295, %s1775_s21   ;;  %s1918_s23 = sadd.s32 1, %s1775_s21   ;;  %s1775_s21 = sphi %s1902_s21, %s2200_s21   ;;  %s1771_s20 = sphi %s1900_s20, %s2204_s20   ;;  %s1767_s19 = sphi %s1898_s19, %s2203_s19   ;;  %s1763_s18 = sphi %s1896_s18, %s2202_s18  }
   0xb   : > { %2183 = sst [smem:[#allocation10_spill]] %s1918_s23  ;;  %s33_s24 = ssub.s32 %s1775_s21, %s1918_s23 }
   0xc   : > { %s36_s25 = sadd.s32 1, %s1771_s20  ;;  %p34_p0 = scmp.eq.s32.totalorder %s33_s24, 0 }
   0xd   : > { %p43_p1 = scmp.ne.s32.totalorder %s1771_s20, %s1767_s19  ;;  %p44_p2 = scmp.eq.s32.totalorder %s1775_s21, 0 }
   0xe   : > { %p49_p3 = scmp.ne.s32.totalorder %s1767_s19, %s1763_s18  ;;  %p2177_p5 = scmp.eq.s32.totalorder %s1915_s22, 0 }
   0xf   : > { %s1928_s26 = scalar_select %p34_p0, %s1771_s20, %s36_s25  }
  0x10   : > { %p1930_p4 = por %p44_p2, %p43_p1  ;;  %p367_p6 = scmp.eq.s32.totalorder %s1915_s22, 1 }
  0x11   : > { %2184 = sst [smem:[#allocation11_spill]] %s1928_s26  ;;  %p1289_p7 = scmp.ge.s32.totalorder %s1775_s21, 1 }
  0x12   : > { %p1939_p8 = por %p2177_p5, %p49_p3  ;;  %p380_p9 = scmp.lt.s32.totalorder %s1775_s21, 3 }
  0x13   : > { %p1944_p10 = por %p367_p6, %p43_p1  ;;  %s2190_s1 = sld [smem:[#allocation13_spill]] }
  0x14   : > { %p1948_p11 = pnand %p1289_p7, %p380_p9  ;;  %s1809_s24 = smov [#allocation4]  }
  0x15   : > { %s2187_s29 = scalar_select %p1944_p10, 1, 0 }
  0x16   : > { %p1471_p12 = pneg %p1948_p11  ;;  %s393_s25 = sshll.u32 %s1809_s24, 4  ;;  %s394_s25 = int_to_ptr.vmem [resolvable:$true] %s393_s25 }
  0x17   : > { %2188 = sst [smem:[#allocation12_spill]] %s2187_s29  ;;  %s1810_s29 = smov 64  }
  0x18   : > { %p1472_p13 = pnand %p1471_p12, %p2177_p5  ;;  %s2191_s9 = sld [smem:[#allocation14_spill]] }
  0x19   : > { %s391_s18 = sshll.u32 %s2190_s1, 4  ;;  %s1811_s14 = smov 4   ;;  %s392_s18 = int_to_ptr.hbm [resolvable:$true] %s391_s18 }
  0x1a   : > { %1474 = dma.hbm_to_vmem [thread:$0]  (!%p1472_p13), %s392_s18, 256, %s394_s25, [#allocation5], %s1810_s29, %s1810_s29, %s1811_s14  }
  0x1b   : > { %s1812_s12 = smov [#allocation6]   ;;  %p1292_p0 = scmp.ge.s32.totalorder %s1775_s21, 2 }
  0x1c   : > { %s428_s16 = sshll.u32 %s1812_s12, 4  ;;  %s429_s16 = int_to_ptr.vmem [resolvable:$true] %s428_s16 }
  0x1d   : > { %453 = sbr.rel (%p1292_p0) target bundleno = 71 (0x47), region = 72 }
  0x1e   : > { %s426_s15 = sshll.u32 %s2191_s9, 4  ;;  %s427_s15 = int_to_ptr.hbm [resolvable:$true] %s426_s15 }
  0x1f   : > { %1477 = dma.hbm_to_vmem [thread:$0]  (!%p1472_p13), %s427_s15, 1024, %s429_s16, [#allocation5], %s1810_s29, %s1810_s29, %s1811_s14  }
  0x22   : > { %456 = sbr.rel (!%p1930_p4) target bundleno = 71 (0x47), region = 76  ;;  %s457_s17 = sand.u32 (%p1930_p4), 1, %s1771_s20  }
  0x23   : > { %s1294_s24 = sshll.u32 (%p1930_p4), %s1775_s21, 1  ;;  %s1293_s23 = sshll.u32 (%p1930_p4), %s457_s17, 3 }
  0x24   : > { %s463_s26 = ssub.s32 (%p1930_p4), 3, %s1294_s24  ;;  %s1970_s14 = scalar_lea.sflag (%p1930_p4), [#allocation3], %s457_s17 }
  0x25   : > { %p464_p1 = scmp.lt.s32.totalorder (%p1930_p4), %s463_s26, 2  ;;  %s461_s15 = scalar_lea.vmem (%p1930_p4), [#allocation2], %s1293_s23 }
  0x27   : > { %s2206_s26 = smov (!%p464_p1, %s463_s26), 2 }
  0x28   : > { %s1295_s18 = sshll.u32 %s2206_s26, 2 }
  0x29   : > { %s467_s12 = ssub.s32 8, %s1295_s18 }
  0x2a   : > { %s468_s25 = sshll.u32 %s467_s12, 4 }
  0x2b   : > { %469 = vsyncadd %s1970_s14, %s468_s25  ;;  %p1973_p2 = scmp.ne.s32.totalorder %s1295_s18, 0  ;;  %s1431_s29 = sshll.u32 %s1775_s21, 3 }
  0x2c   : > { %s472_s1 = scalar_lea.hbm %s2157_s0, %s1431_s29  ;;  %s1981_s9 = sshll.u32 %s461_s15, 4  ;;  %s477_s9 = int_to_ptr.vmem [resolvable:$true] %s1981_s9 }
  0x2d   : > { %s474_s17 = sshll.u32 %s472_s1, 4  ;;  %s2176_s23 = sshll.u32 %s2206_s26, 6  ;;  %s1984_s17 = int_to_ptr.hbm [resolvable:$true] %s474_s17 }
  0x2e   : > { %s1666_s12 = sshra.s32 %s1984_s17, 4  ;;  %s1668_s18 = sshrl.u32 %s2176_s23, 4  ;;  %s1667_s12 = int_to_ptr.hbm [resolvable:$true] %s1666_s12 }
  0x2f   : > { %s1673_s25 = scalar_lea.hbm %s1667_s12, %s1668_s18  ;;  %s1677_s15 = scalar_lea.hbm %s2157_s0, 12 }
  0x30   : > { %p1674_p3 = scmp.ne.s32.totalorder %s1667_s12, %s1673_s25  ;;  %p1678_p7 = scmp.lt.s32.totalorder %s1667_s12, %s2157_s0 }
  0x31   : > { %p1679_p9 = scmp.lt.s32.totalorder %s1677_s15, %s1673_s25 }
  0x32   : > { %p1675_p4 = pnand %p1674_p3, %p1973_p2 }
  0x33   : > { %p1680_p12 = por %p1679_p9, %p1678_p7 }
  0x34   : > { %p1676_p6 = pneg %p1675_p4 }
  0x36   : > { %p1681_p13 = pnand %p1680_p12, %p1676_p6 }
  0x38   : > { %1684 = shalt.err (!%p1681_p13)
}
  0x39   : > { %s1685_s24 = sshra.s32 %s477_s9, 4  ;;  %s1813_s21 = smov [#allocation2]   ;;  %s1686_s24 = int_to_ptr.vmem [resolvable:$true] %s1685_s24 }
  0x3a   : > { %s1692_s23 = scalar_lea.vmem %s1686_s24, %s1668_s18  ;;  %s1696_s29 = scalar_lea.vmem %s1813_s21, 16 }
  0x3b   : > { %p1693_p0 = scmp.ne.s32.totalorder %s1686_s24, %s1692_s23  ;;  %p1698_p4 = scmp.lt.s32.totalorder %s1696_s29, %s1692_s23 }
  0x3d   : > { %p1694_p1 = pnand %p1693_p0, %p1973_p2 }
  0x3f   : > { %p1695_p3 = pneg %p1694_p1 }
  0x41   : > { %p1700_p5 = pnand %p1698_p4, %p1695_p3 }
  0x43   : > { %1703 = shalt.err (!%p1700_p5)
}
  0x44   : > { %s1814_s12 = smov 64   ;;  %s1815_s25 = smov 4  }
  0x45   : > { %s2193_s15 = sshll.u32 %s2206_s26, 6 }
  0x46   : > { %482 = dma.hbm_to_vmem [thread:$0]  (%p1973_p2), %s1984_s17, %s2193_s15, %s477_s9, %s1970_s14, %s1814_s12, %s1814_s12, %s1815_s25  }
  0x47 PF: > { %488 = sbr.rel (%p1948_p11) target bundleno = 1497 (0x5d9), region = 80  ;;  %s2013_s23 = sand.u32 (!%p1948_p11), 1, %s1767_s19  }
  0x48   : > { %s1301_s18 = sshll.u32 (!%p1948_p11), %s2013_s23, 3  ;;  %s491_s16 = scalar_lea.sflag (!%p1948_p11), [#allocation3], %s2013_s23 }
  0x49   : > { %s494_s1 = scalar_lea.vmem (!%p1948_p11), [#allocation2], %s1301_s18 }
  0x4c   : > { %1754 = dma.done.wait (%p1939_p8), %s491_s16, 128  }
  0x4d   : > { %1756 = vsyncadd (%p1939_p8), %s491_s16, 4294967168  ;;  %p2194_p5 = scmp.eq.s32.totalorder %s1915_s22, 0 }
  0x4f   : > { %1758 = dma.done.wait (%p2194_p5), [#allocation5], 1280   ;;  %p2195_p2 = pmov %p2194_p5 }
  0x50   : > { %v1434_v0 = vld [vmem:[#allocation4 + $0x8] sm:$0xff]  ;;  %v1433_v1 = vld [vmem:[#allocation4] sm:$0xff]  ;;  %v1432_v2 = vld [vmem:[%s494_s1] sm:$0xff]  ;;  %vm589_vm0 = vcmask 261120   ;;  %v617_v8 = vlaneseq  ;;  %s2196_s28 = sld [smem:[#allocation15_spill]]  ;;  %s1304_s26 = sshll.u32 %s2013_s23, 4 }
  0x51   : > { %1760 = vsyncadd (%p2195_p2), [#allocation5], 4294966016  ;;  %599 = vmatpush.bf16.msra.mxu0 %v1434_v0  ;;  %v1584_v3 = vld [vmem:[%s2159_s2] ss:$0 sm:$0xff]  ;;  %v1442_v20 = vld [vmem:[%s2162_s5 + $0x38] sm:$0xff]  ;;  %s2197_s17 = sld [smem:[#allocation16_spill]] }
  0x52   : > { %v2028_v10 = vand.u32 127, %v617_v8  ;;  %737 = vmatpush.bf16.msra.mxu1 %v1442_v20  ;;  %v1441_v21 = vld [vmem:[%s2162_s5 + $0x30] sm:$0xff]  ;;  %v1440_v22 = vld [vmem:[%s2162_s5 + $0x28] sm:$0xff]  ;;  %v1439_v23 = vld [vmem:[%s2162_s5 + $0x20] sm:$0xff]  ;;  %s2109_s24 = scalar_lea.vmem [#allocation7], %s1304_s26   ;;  %s1415_s23 = sshll.u32 (%p1944_p10), %s1915_s22, 1 }
  0x53   : > { %v1438_v24 = vld [vmem:[%s2162_s5 + $0x18] sm:$0xff]  ;;  %v1437_v25 = vld [vmem:[%s2162_s5 + $0x10] sm:$0xff]  ;;  %v1436_v26 = vld [vmem:[%s2162_s5 + $0x8] sm:$0xff]  ;;  %s1459_s29 = sshll.u32 (%p1944_p10), %s1915_s22, 4  ;;  %s1046_s12 = ssub.s32 (%p1944_p10), 3, %s1415_s23 }
  0x54   : > { %vm619_vm1 = vcmp.lt.s32.totalorder %v2028_v10, 32  ;;  %v1435_v29 = vld [vmem:[%s2162_s5] sm:$0xff]  ;;  %vm761_vm8 = vcmp.lt.s32.totalorder %v2028_v10, 16  ;;  %vm903_vm15 = vcmp.lt.s32.totalorder %v2028_v10, 8  ;;  %v1456_v10 = vld [vmem:[%s2170_s13 + $0x28] sm:$0xff]  ;;  %s2199_s18 = sld [smem:[#allocation17_spill]] (%p1944_p10) }
  0x55   : > { %600 = vmatpush.bf16.msra.mxu0 %v1433_v1  ;;  %v1585_v46 = vld [vmem:[%s2160_s3] ss:$0 sm:$0xff]  ;;  %p1047_p8 = scmp.lt.s32.totalorder (%p1944_p10), %s1046_s12, 2 }
  0x56   : > { %738 = vmatpush.bf16.msra.mxu1 %v1441_v21  ;;  %v1586_v50 = vld [vmem:[%s2161_s4] ss:$0 sm:$0xff] }
  0x57   : > { %v1587_v59 = vld [vmem:[%s2163_s6] ss:$0 sm:$0xff] }
  0x58   : > { %1317 = vmatmul.msk.bf16.vlgmr.msra.gmra.mxu0 %vm589_vm0, %v1432_v2  ;;  %v1443_v20 = vld [vmem:[#allocation6] sm:$0xff] }
  0x5a   : > { %739 = vmatpush.bf16.msra.mxu1 %v1440_v22  ;;  %s2120_s16 = scalar_lea.vmem (%p1944_p10), %s2199_s18, %s1459_s29  }
  0x5e   : > { %740 = vmatpush.bf16.msra.mxu1 %v1439_v23 }
  0x62   : > { %741 = vmatpush.bf16.msra.mxu1 %v1438_v24 }
  0x66   : > { %742 = vmatpush.bf16.msra.mxu1 %v1437_v25 }
  0x6a   : > { %743 = vmatpush.bf16.msra.mxu1 %v1436_v26 }
  0x6e   : > { %744 = vmatpush.bf16.msra.mxu1 %v1435_v29 }
  0xd5   : > { %v602_v4 = vpop.f32.mrf.mxu0 }
  0xd6   : > { %v603_v5 = vadd.f32 %v1584_v3, %v602_v4 }
  0xd8   : > { %609 = vadd.xlane.f32.xlu0 %v603_v5 }
  0xdd   : > { %v604_v6 = vpop.f32.mrf.mxu0 }
  0xde   : > { %v605_v7 = vadd.f32 %v1584_v3, %v604_v6 }
  0xe0   : > { %611 = vadd.xlane.f32.xlu0 %v605_v7 }
 0x14b   : > { %v610_v9 = vpop.xlane.xlu0 %609 }
 0x14c   : > { %v613_v11 = vmul.f32 0.03125, %v610_v9 }
 0x14e   : > { %v615_v12 = vsub.f32 %v603_v5, %v613_v11  ;;  %v1450_v11 = vld [vmem:[#allocation6 + $0x38] sm:$0xff] }
 0x14f   : > { %879 = vmatpush.bf16.msra.mxu2 %v1450_v11 }
 0x150   : > { %v620_v13 = vmul.f32 %v615_v12, %v615_v12 }
 0x152   : > { %v624_v14 = vsel %vm619_vm1, %v620_v13, 0.0  ;;  %v1448_v13 = vld [vmem:[#allocation6 + $0x28] sm:$0xff] }
 0x153   : > { %626 = vadd.xlane.f32.xlu1 %v624_v14  ;;  %v612_v15 = vpop.xlane.xlu0 %611  ;;  %v1447_v14 = vld [vmem:[#allocation6 + $0x20] sm:$0xff] }
 0x154   : > { %v614_v16 = vmul.f32 0.03125, %v612_v15  ;;  %v1446_v15 = vld [vmem:[#allocation6 + $0x18] sm:$0xff] }
 0x156   : > { %v616_v17 = vsub.f32 %v605_v7, %v614_v16  ;;  %v1445_v16 = vld [vmem:[#allocation6 + $0x10] sm:$0xff] }
 0x158   : > { %v621_v18 = vmul.f32 %v616_v17, %v616_v17 }
 0x15a   : > { %v625_v19 = vsel %vm619_vm1, %v621_v18, 0.0 }
 0x15b   : > { %628 = vadd.xlane.f32.xlu1 %v625_v19 }
 0x1c6   : > { %v627_v27 = vpop.xlane.xlu1 %626 }
 0x1c7   : > { %v630_v28 = vmul.f32 0.03125, %v627_v27 }
 0x1c9   : > { %v632_v30 = vadd.f32 1e-05, %v630_v28 }
 0x1cb   : > { %1594 = vrsqrt.f32 %v632_v30  ;;  %vm640_vm3 = vweird.f32 %v632_v30 }
 0x1ce   : > { %v629_v31 = vpop.xlane.xlu1 %628 }
 0x1cf   : > { %v631_v32 = vmul.f32 0.03125, %v629_v31 }
 0x1d1   : > { %v1595_v33 = vpop.eup %1594  ;;  %v633_v34 = vadd.f32 1e-05, %v631_v32 }
 0x1d2   : > { %v635_v35 = vmul.f32 %v1595_v33, %v632_v30  ;;  %vm641_vm2 = vweird.f32 %v1595_v33 }
 0x1d3   : > { %1596 = vrsqrt.f32 %v633_v34  ;;  %vm642_vm4 = vmor %vm640_vm3, %vm641_vm2  ;;  %vm650_vm6 = vweird.f32 %v633_v34 }
 0x1d4   : > { %v636_v36 = vmul.f32 %v1595_v33, %v635_v35 }
 0x1d6   : > { %v637_v37 = vmul.f32 0.5, %v636_v36 }
 0x1d8   : > { %v638_v38 = vsub.f32 1.5, %v637_v37  ;;  %v1588_v37 = vld [vmem:[%s2164_s7] ss:$0 sm:$0xff] }
 0x1d9   : > { %v1597_v39 = vpop.eup %1596 }
 0x1da   : > { %v639_v40 = vmul.f32 %v1595_v33, %v638_v38  ;;  %v645_v41 = vmul.f32 %v1597_v39, %v633_v34  ;;  %vm651_vm5 = vweird.f32 %v1597_v39 }
 0x1db   : > { %vm652_vm7 = vmor %vm650_vm6, %vm651_vm5  ;;  %vm1035_vm6 = vcmask 31744  }
 0x1dc   : > { %v643_v42 = vsel %vm642_vm4, %v1595_v33, %v639_v40  ;;  %v646_v43 = vmul.f32 %v1597_v39, %v645_v41  ;;  %v1589_v41 = vld [vmem:[%s2165_s8] ss:$0 sm:$0xff] }
 0x1dd   : > { %v654_v45 = vmul.f32 %v643_v42, %v615_v12  ;;  %v1449_v12 = vld [vmem:[#allocation6 + $0x30] sm:$0xff] }
 0x1de   : > { %v647_v44 = vmul.f32 0.5, %v646_v43  ;;  %880 = vmatpush.bf16.msra.mxu2 %v1449_v12 }
 0x1df   : > { %v659_v49 = vmul.f32 %v1585_v46, %v654_v45 }
 0x1e0   : > { %v648_v47 = vsub.f32 1.5, %v647_v44 }
 0x1e1   : > { %v664_v54 = vadd.f32 %v1586_v50, %v659_v49 }
 0x1e2   : > { %v649_v48 = vmul.f32 %v1597_v39, %v648_v47  ;;  %881 = vmatpush.bf16.msra.mxu2 %v1448_v13 }
 0x1e3   : > { %v666_v56 = vmax.f32 %v664_v54, 0.0 }
 0x1e4   : > { %v653_v51 = vsel %vm652_vm7, %v1597_v39, %v649_v48 }
 0x1e5   : > { %v655_v52 = vmul.f32 %v653_v51, %v616_v17  ;;  %v1444_v17 = vld [vmem:[#allocation6 + $0x8] sm:$0xff] }
 0x1e6   : > { %882 = vmatpush.bf16.msra.mxu2 %v1447_v14 }
 0x1e7   : > { %v660_v53 = vmul.f32 %v1585_v46, %v655_v52 }
 0x1e9   : > { %v665_v55 = vadd.f32 %v1586_v50, %v660_v53  ;;  %v1590_v50 = vld [vmem:[%s2167_s10] ss:$0 sm:$0xff] }
 0x1ea   : > { %883 = vmatpush.bf16.msra.mxu2 %v1446_v15 }
 0x1eb   : > { %v667_v57 = vmax.f32 %v665_v55, 0.0 }
 0x1ed   : > { %v668_v58 = vpack.c.bf16 %v667_v57, %v666_v56 }
 0x1ee   : > { %884 = vmatpush.bf16.msra.mxu2 %v1445_v16 }
 0x1ef   : > { %745 = vmatmul.bf16.vlgmr.msra.gmra.mxu1 %v668_v58 }
 0x1f2   : > { %885 = vmatpush.bf16.msra.mxu2 %v1444_v17 }
 0x1f6   : > { %886 = vmatpush.bf16.msra.mxu2 %v1443_v20 }
 0x26c   : > { %v746_v60 = vpop.f32.mrf.mxu1 }
 0x26d   : > { %v747_v61 = vadd.f32 %v1587_v59, %v746_v60 }
 0x26f   : > { %753 = vadd.xlane.f32.xlu2 %v747_v61 }
 0x274   : > { %v748_v62 = vpop.f32.mrf.mxu1 }
 0x275   : > { %v749_v63 = vadd.f32 %v1587_v59, %v748_v62 }
 0x277   : > { %755 = vadd.xlane.f32.xlu2 %v749_v63 }
 0x2e2   : > { %v754_v0 = vpop.xlane.xlu2 %753 }
 0x2e3   : > { %v757_v1 = vmul.f32 0.0625, %v754_v0 }
 0x2e5   : > { %v759_v2 = vsub.f32 %v747_v61, %v757_v1  ;;  %v1458_v1 = vld [vmem:[%s2170_s13 + $0x38] sm:$0xff] }
 0x2e6   : > { %1021 = vmatpush.bf16.msra.mxu3 %v1458_v1 }
 0x2e7   : > { %v762_v3 = vmul.f32 %v759_v2, %v759_v2 }
 0x2e9   : > { %v766_v4 = vsel %vm761_vm8, %v762_v3, 0.0  ;;  %v1455_v3 = vld [vmem:[%s2170_s13 + $0x20] sm:$0xff] }
 0x2ea   : > { %768 = vadd.xlane.f32.xlu0 %v766_v4  ;;  %v756_v5 = vpop.xlane.xlu2 %755  ;;  %v1454_v4 = vld [vmem:[%s2170_s13 + $0x18] sm:$0xff] }
 0x2eb   : > { %v758_v6 = vmul.f32 0.0625, %v756_v5  ;;  %v1453_v5 = vld [vmem:[%s2170_s13 + $0x10] sm:$0xff] }
 0x2ed   : > { %v760_v7 = vsub.f32 %v749_v63, %v758_v6  ;;  %v1452_v6 = vld [vmem:[%s2170_s13 + $0x8] sm:$0xff] }
 0x2ef   : > { %v763_v8 = vmul.f32 %v760_v7, %v760_v7 }
 0x2f1   : > { %v767_v9 = vsel %vm761_vm8, %v763_v8, 0.0 }
 0x2f2   : > { %770 = vadd.xlane.f32.xlu1 %v767_v9  ;;  %v1451_v9 = vld [vmem:[%s2170_s13] sm:$0xff] }
 0x35d   : > { %v769_v18 = vpop.xlane.xlu0 %768 }
 0x35e   : > { %v772_v19 = vmul.f32 0.0625, %v769_v18 }
 0x360   : > { %v774_v21 = vadd.f32 1e-05, %v772_v19 }
 0x362   : > { %1598 = vrsqrt.f32 %v774_v21  ;;  %vm782_vm10 = vweird.f32 %v774_v21 }
 0x365   : > { %v771_v22 = vpop.xlane.xlu1 %770 }
 0x366   : > { %v773_v23 = vmul.f32 0.0625, %v771_v22 }
 0x368   : > { %v1599_v24 = vpop.eup %1598  ;;  %v775_v25 = vadd.f32 1e-05, %v773_v23 }
 0x369   : > { %v777_v26 = vmul.f32 %v1599_v24, %v774_v21  ;;  %vm783_vm9 = vweird.f32 %v1599_v24 }
 0x36a   : > { %1600 = vrsqrt.f32 %v775_v25  ;;  %vm784_vm11 = vmor %vm782_vm10, %vm783_vm9  ;;  %vm792_vm13 = vweird.f32 %v775_v25 }
 0x36b   : > { %v778_v27 = vmul.f32 %v1599_v24, %v777_v26 }
 0x36d   : > { %v779_v28 = vmul.f32 0.5, %v778_v27  ;;  %v1591_v27 = vld [vmem:[%s2168_s11] ss:$0 sm:$0xff] }
 0x36f   : > { %v780_v29 = vsub.f32 1.5, %v779_v28 }
 0x370   : > { %v1601_v30 = vpop.eup %1600 }
 0x371   : > { %v781_v31 = vmul.f32 %v1599_v24, %v780_v29  ;;  %v787_v32 = vmul.f32 %v1601_v30, %v775_v25  ;;  %vm793_vm12 = vweird.f32 %v1601_v30 }
 0x372   : > { %vm794_vm14 = vmor %vm792_vm13, %vm793_vm12 }
 0x373   : > { %v785_v33 = vsel %vm784_vm11, %v1599_v24, %v781_v31  ;;  %v788_v34 = vmul.f32 %v1601_v30, %v787_v32  ;;  %v1592_v31 = vld [vmem:[%s2196_s28] ss:$0 sm:$0xff] }
 0x374   : > { %v796_v36 = vmul.f32 %v785_v33, %v759_v2  ;;  %v1457_v2 = vld [vmem:[%s2170_s13 + $0x30] sm:$0xff] }
 0x375   : > { %v789_v35 = vmul.f32 0.5, %v788_v34  ;;  %1022 = vmatpush.bf16.msra.mxu3 %v1457_v2 }
 0x376   : > { %v801_v40 = vmul.f32 %v1588_v37, %v796_v36 }
 0x377   : > { %v790_v38 = vsub.f32 1.5, %v789_v35 }
 0x378   : > { %v806_v45 = vadd.f32 %v1589_v41, %v801_v40  ;;  %v1593_v40 = vld [vmem:[%s2197_s17] ss:$0 sm:$0xff] }
 0x379   : > { %v791_v39 = vmul.f32 %v1601_v30, %v790_v38  ;;  %1023 = vmatpush.bf16.msra.mxu3 %v1456_v10 }
 0x37a   : > { %v808_v47 = vmax.f32 %v806_v45, 0.0 }
 0x37b   : > { %v795_v42 = vsel %vm794_vm14, %v1601_v30, %v791_v39 }
 0x37c   : > { %v797_v43 = vmul.f32 %v795_v42, %v760_v7 }
 0x37d   : > { %1024 = vmatpush.bf16.msra.mxu3 %v1455_v3 }
 0x37e   : > { %v802_v44 = vmul.f32 %v1588_v37, %v797_v43 }
 0x380   : > { %v807_v46 = vadd.f32 %v1589_v41, %v802_v44 }
 0x381   : > { %1025 = vmatpush.bf16.msra.mxu3 %v1454_v4 }
 0x382   : > { %v809_v48 = vmax.f32 %v807_v46, 0.0 }
 0x384   : > { %v810_v49 = vpack.c.bf16 %v809_v48, %v808_v47 }
 0x385   : > { %1026 = vmatpush.bf16.msra.mxu3 %v1453_v5 }
 0x386   : > { %887 = vmatmul.bf16.vlgmr.msra.gmra.mxu2 %v810_v49 }
 0x389   : > { %1027 = vmatpush.bf16.msra.mxu3 %v1452_v6 }
 0x38d   : > { %1028 = vmatpush.bf16.msra.mxu3 %v1451_v9 }
 0x409   : > { %v888_v51 = vpop.f32.mrf.mxu2 }
 0x40a   : > { %v889_v52 = vadd.f32 %v1590_v50, %v888_v51 }
 0x40c   : > { %895 = vadd.xlane.f32.xlu2 %v889_v52 }
 0x411   : > { %v890_v53 = vpop.f32.mrf.mxu2 }
 0x412   : > { %v891_v54 = vadd.f32 %v1590_v50, %v890_v53 }
 0x414   : > { %897 = vadd.xlane.f32.xlu0 %v891_v54 }
 0x47f   : > { %v896_v55 = vpop.xlane.xlu2 %895 }
 0x480   : > { %v899_v56 = vmul.f32 0.125, %v896_v55 }
 0x482   : > { %v901_v57 = vsub.f32 %v889_v52, %v899_v56 }
 0x484   : > { %v904_v58 = vmul.f32 %v901_v57, %v901_v57 }
 0x486   : > { %v908_v59 = vsel %vm903_vm15, %v904_v58, 0.0 }
 0x487   : > { %v898_v60 = vpop.xlane.xlu0 %897  ;;  %910 = vadd.xlane.f32.xlu1 %v908_v59 }
 0x488   : > { %v900_v61 = vmul.f32 0.125, %v898_v60 }
 0x48a   : > { %v902_v62 = vsub.f32 %v891_v54, %v900_v61 }
 0x48c   : > { %v905_v63 = vmul.f32 %v902_v62, %v902_v62 }
 0x48e   : > { %v909_v0 = vsel %vm903_vm15, %v905_v63, 0.0 }
 0x48f   : > { %912 = vadd.xlane.f32.xlu2 %v909_v0 }
 0x4fa   : > { %v911_v7 = vpop.xlane.xlu1 %910 }
 0x4fb   : > { %v914_v8 = vmul.f32 0.125, %v911_v7 }
 0x4fd   : > { %v916_v11 = vadd.f32 1e-05, %v914_v8 }
 0x4ff   : > { %1602 = vrsqrt.f32 %v916_v11  ;;  %vm924_vm1 = vweird.f32 %v916_v11 }
 0x502   : > { %v913_v12 = vpop.xlane.xlu2 %912 }
 0x503   : > { %v915_v13 = vmul.f32 0.125, %v913_v12 }
 0x505   : > { %v1603_v14 = vpop.eup %1602  ;;  %v917_v15 = vadd.f32 1e-05, %v915_v13 }
 0x506   : > { %v919_v16 = vmul.f32 %v1603_v14, %v916_v11  ;;  %vm925_vm0 = vweird.f32 %v1603_v14 }
 0x507   : > { %1604 = vrsqrt.f32 %v917_v15  ;;  %vm926_vm2 = vmor %vm924_vm1, %vm925_vm0  ;;  %vm934_vm4 = vweird.f32 %v917_v15 }
 0x508   : > { %v920_v17 = vmul.f32 %v1603_v14, %v919_v16 }
 0x50a   : > { %v921_v18 = vmul.f32 0.5, %v920_v17 }
 0x50c   : > { %v922_v19 = vsub.f32 1.5, %v921_v18 }
 0x50d   : > { %v1605_v20 = vpop.eup %1604 }
 0x50e   : > { %v923_v21 = vmul.f32 %v1603_v14, %v922_v19  ;;  %v929_v22 = vmul.f32 %v1605_v20, %v917_v15  ;;  %vm935_vm3 = vweird.f32 %v1605_v20 }
 0x50f   : > { %vm936_vm5 = vmor %vm934_vm4, %vm935_vm3 }
 0x510   : > { %v927_v23 = vsel %vm926_vm2, %v1603_v14, %v923_v21  ;;  %v930_v24 = vmul.f32 %v1605_v20, %v929_v22 }
 0x511   : > { %v938_v26 = vmul.f32 %v927_v23, %v901_v57 }
 0x512   : > { %v931_v25 = vmul.f32 0.5, %v930_v24 }
 0x513   : > { %v943_v30 = vmul.f32 %v1591_v27, %v938_v26 }
 0x514   : > { %v932_v28 = vsub.f32 1.5, %v931_v25 }
 0x515   : > { %v948_v35 = vadd.f32 %v1592_v31, %v943_v30 }
 0x516   : > { %v933_v29 = vmul.f32 %v1605_v20, %v932_v28 }
 0x517   : > { %v950_v37 = vmax.f32 %v948_v35, 0.0 }
 0x518   : > { %v937_v32 = vsel %vm936_vm5, %v1605_v20, %v933_v29 }
 0x519   : > { %v939_v33 = vmul.f32 %v937_v32, %v902_v62 }
 0x51b   : > { %v944_v34 = vmul.f32 %v1591_v27, %v939_v33 }
 0x51d   : > { %v949_v36 = vadd.f32 %v1592_v31, %v944_v34 }
 0x51f   : > { %v951_v38 = vmax.f32 %v949_v36, 0.0 }
 0x521   : > { %v952_v39 = vpack.c.bf16 %v951_v38, %v950_v37 }
 0x523   : > { %1029 = vmatmul.bf16.vlgmr.msra.gmra.mxu3 %v952_v39 }
 0x5a6   : > { %v1030_v41 = vpop.f32.mrf.mxu3 }
 0x5a7   : > { %v1031_v42 = vadd.f32 %v1593_v40, %v1030_v41 }
 0x5a9   : > { %1036 = vst.msk [vmem:[%s2109_s24] sm:$0xff] %vm1035_vm6, %v1031_v42 }
 0x5ad   : > { %1044 = sbr.rel (!%p1944_p10) target bundleno = 1497 (0x5d9), region = 96 }
 0x5ae   : > { %v1032_v43 = vpop.f32.mrf.mxu3 }
 0x5af   : > { %v1033_v44 = vadd.f32 %v1593_v40, %v1032_v43 }
 0x5b1   : > { %1037 = vst.msk [vmem:[%s2109_s24 + $0x8] sm:$0xff] %vm1035_vm6, %v1033_v44 }
 0x5b2   : > { %s2208_s12 = smov (!%p1047_p8, %s1046_s12), 2 }
 0x5b3   : > { %s1416_s1 = sshll.u32 %s2208_s12, 3 }
 0x5b4   : > { %p1419_p11 = scmp.eq.s32.totalorder %s1416_s1, 0 }
 0x5b5   : > { %s2126_s9 = sshrl.u32 (!%p1419_p11), %s2208_s12, 1 }
 0x5b6   : > { %1055 = sbr.rel (%p1419_p11) target bundleno = 1497 (0x5d9), region = 100  ;;  %p1420_p10 = scmp.le.s32.totalorder (!%p1419_p11), %s2126_s9, 0 }
 0x5bb   : > { %1223 = sbr.rel (%p1420_p10) target bundleno = 1480 (0x5c8), region = 182  ;;  %s1777_s22 = smov (!%p1420_p10), %s2120_s16  }
 0x5bc   : > { %s1781_s30 = smov (!%p1420_p10), %s2109_s24   ;;  %s1785_s28 = smov (!%p1420_p10), 0  }
 0x5bd   : > { %s1789_s26 = smov (!%p1420_p10), 0  }
 0x5c0 LB: >> { %v1120_v45 = vld [vmem:[%s1783_s30] sm:$0xff]  ;;  %v1122_v46 = vld [vmem:[%s1783_s30 + $0x8] sm:$0xff]  ;;  %s1124_s14 = sadd.s32 1, %s1787_s28  ;;  %s1114_s26 = sadd.s32 1, %s1791_s26   ;;  %s1791_s26 = sphi %s1789_s26, %s1114_s26   ;;  %s1787_s28 = sphi %s1785_s28, %s1786_s28   ;;  %s1783_s30 = sphi %s1781_s30, %s1129_s30   ;;  %s1779_s22 = sphi %s1777_s22, %s1130_s22  }
 0x5c1   : >> { %1121 = vst [vmem:[%s1779_s22] sm:$0xff] %v1120_v45  ;;  %p1125_p6 = scmp.ge.s32.totalorder %s1124_s14, %s2126_s9  ;;  %p1113_p7 = scmp.ge.s32.totalorder %s1114_s26, %s2126_s9 }
 0x5c2   : >> { %1123 = vst [vmem:[%s1779_s22 + $0x8] sm:$0xff] %v1122_v46 }
 0x5c3   : >> { %s2210_s14 = smov (%p1125_p6, %s1124_s14), 0  ;;  %1116 = sbr.rel (!%p1113_p7) target bundleno = 1472 (0x5c0), region = 188 }
 0x5c4   : >> { %s1421_s27 = sshll.u32 %s2210_s14, 4  ;;  %s1786_s28 = smov %s2210_s14  }
 0x5c5   : >> { %s1129_s30 = scalar_lea.vmem %s2109_s24, %s1421_s27 [#allocation7]   ;;  %s1130_s22 = scalar_lea.vmem %s2120_s16, %s1421_s27  }
 0x5c8 PF: > { %s2136_s17 = sand.u32 1, %s2208_s12   ;;  %s1460_s21 = sshll.u32 %s2126_s9, 4 }
 0x5c9   : > { %s1135_s23 = scalar_lea.vmem %s2109_s24, %s1460_s21 [#allocation7]   ;;  %s1137_s29 = scalar_lea.vmem %s2120_s16, %s1460_s21  }
 0x5ca   : > { %p1426_p9 = scmp.le.s32.totalorder %s2136_s17, 0 }
 0x5cb   : > { %s1793_s25 = smov (!%p1426_p9), %s1137_s29   ;;  %s1797_s15 = smov (!%p1426_p9), %s1135_s23  }
 0x5cc   : > { %1237 = sbr.rel (%p1426_p9) target bundleno = 1497 (0x5d9), region = 193  ;;  %s1801_s18 = smov (!%p1426_p9), 0  }
 0x5cd   : > { %s1805_s1 = smov (!%p1426_p9), 0  }
 0x5d1 LB: >> { %v1147_v47 = vld [vmem:[%s1799_s15] sm:$0xff]  ;;  %s1149_s12 = sadd.s32 1, %s1803_s18  ;;  %s1141_s1 = sadd.s32 1, %s1807_s1   ;;  %s1807_s1 = sphi %s1805_s1, %s1141_s1   ;;  %s1803_s18 = sphi %s1801_s18, %s1802_s18   ;;  %s1799_s15 = sphi %s1797_s15, %s1154_s15   ;;  %s1795_s25 = sphi %s1793_s25, %s1155_s25  }
 0x5d2   : >> { %1148 = vst [vmem:[%s1795_s25] sm:$0xff] %v1147_v47  ;;  %p1150_p12 = scmp.ge.s32.totalorder %s1149_s12, %s2136_s17  ;;  %p1140_p13 = scmp.ge.s32.totalorder %s1141_s1, %s2136_s17 }
 0x5d4   : >> { %s2212_s12 = smov (%p1150_p12, %s1149_s12), 0  ;;  %1143 = sbr.rel (!%p1140_p13) target bundleno = 1489 (0x5d1), region = 199 }
 0x5d5   : >> { %s1427_s24 = sshll.u32 %s2212_s12, 3  ;;  %s1802_s18 = smov %s2212_s12  }
 0x5d6   : >> { %s1154_s15 = scalar_lea.vmem %s1135_s23, %s1427_s24 [#allocation7]   ;;  %s1155_s25 = scalar_lea.vmem %s1137_s29, %s1427_s24  }
 0x5d9 PF: > { %s2200_s21 = sld [smem:[#allocation10_spill]]  ;;  %s2202_s18 = smov %s1767_s19 }
 0x5da   : > { %s2201_s16 = sld [smem:[#allocation11_spill]]  ;;  %s2203_s19 = smov %s1771_s20 }
 0x5df   : > { %p26_p0 = scmp.ge.s32.totalorder %s2200_s21, 4  }
 0x5e0   : > { %s2204_s20 = smov %s2201_s16 }
 0x5e1   :  { %28 = sbr.rel (!%p26_p0) target bundleno = 10 (0xa), region = 210 }
 0x5e6   :  { %1171 = vsyncpa [#allocation3], 1 }
 0x5e7   :  { %1173 = vsyncpa [#allocation3 + $0x1], 1 }
 0x5e8   :  { %1174 = vsyncpa [#allocation5], 1 }

</bundles_post_ra>
